<compile_context>
chip_gen: v6e
topology: v6e:2x2x1
jax: 0.10.0
libtpu: 0.0.40
codegen_flags: <defaults>
</compile_context>

<pallas_src>
import math
import functools

import jax
import jax.numpy as jnp
from jax import lax
from jax.experimental import pallas as pl
from jax.experimental.pallas import tpu as pltpu


# ----------------------------------------------------------------------------
# Shared in-kernel helper: cl_fc projection + L2 row-normalisation
#   y = x @ W_t + b;  y = y / (||y||_2 + 1e-12)
# ----------------------------------------------------------------------------
def _project_normalize(x, w_t, b):
    y = jnp.dot(x, w_t, preferred_element_type=jnp.float32) + b        # (B, H)
    nrm = jnp.sqrt(jnp.sum(y * y, axis=1, keepdims=True))              # (B, 1)
    # narrow reciprocal + wide multiply; epsilon placement matches torch.
    return y * (1.0 / (nrm + 1e-12))


# ----------------------------------------------------------------------------
# Kernel 1 (warm-up phase, bank not yet full):
#   project the current batch and shift it into the FIFO feature bank.
#   new_bank = concat(bank[batch:], feats)   (newest rows at the end)
# ----------------------------------------------------------------------------
def _proj_update_kernel(x_ref, w_ref, b_ref, bank_ref, newbank_ref, *, batch):
    mem = bank_ref.shape[0]
    m = mem - batch
    feats = _project_normalize(x_ref[...], w_ref[...], b_ref[...])
    if m > 0:
        newbank_ref[pl.ds(0, m), :] = bank_ref[pl.ds(batch, m), :]
    newbank_ref[pl.ds(m, batch), :] = feats


# ----------------------------------------------------------------------------
# Kernel 2 (steady state, bank full): fused projection + bank update + loss.
#   Anchors = the current batch only (the last `batch` rows of the full
#   (mem, H) matrix), columns = updated bank (mem rows).  All loss
#   temporaries are (batch, mem).
# ----------------------------------------------------------------------------
def _fused_loss_kernel(x_ref, w_ref, b_ref, bank_ref, lab_row_ref, cur_lab_ref,
                       newbank_ref, loss_ref, *, batch, inv_temperature, omega):
    mem = bank_ref.shape[0]
    m = mem - batch

    # --- projection + normalisation of the current batch -------------------
    feats = _project_normalize(x_ref[...], w_ref[...], b_ref[...])     # (B, H)

    # --- FIFO bank update: drop oldest `batch` rows, append current --------
    if m > 0:
        newbank_ref[pl.ds(0, m), :] = bank_ref[pl.ds(batch, m), :]
    newbank_ref[pl.ds(m, batch), :] = feats
    cols = newbank_ref[...]                                            # (mem, H)

    # --- logits: fold 1/temperature into the small operand, contract the
    #     last dims of both operands (no explicit transpose) ----------------
    scaled = feats * inv_temperature                                   # (B, H)
    logits = lax.dot_general(scaled, cols,
                             dimension_numbers=(((1,), (1,)), ((), ())),
                             preferred_element_type=jnp.float32)       # (B, mem)
    logits = logits - jnp.max(logits, axis=1, keepdims=True)

    # --- masks (only for the anchor rows) -----------------------------------
    mask = (cur_lab_ref[...] == lab_row_ref[...]).astype(jnp.float32)  # (B, mem)
    col_ids = lax.broadcasted_iota(jnp.int32, (batch, mem), 1)
    row_ids = lax.broadcasted_iota(jnp.int32, (batch, mem), 0)
    self_mask = (col_ids == row_ids + m).astype(jnp.float32)           # eye rows
    positive_mask = mask - self_mask        # diag of mask is 1 -> mask*(1-eye)
    negative_mask = 1.0 - mask              # already 0 on the diagonal

    # --- intra-affinitive contrastive loss ----------------------------------
    e = jnp.exp(logits)
    neg_sum = jnp.sum(e * negative_mask, axis=1, keepdims=True)        # (B, 1)
    uniformity = omega * e * positive_mask + neg_sum                   # (B, mem)
    log_prob = logits - jnp.log(uniformity + 1e-6)
    pos_cnt = jnp.sum(positive_mask, axis=1, keepdims=True)
    row_lp = (jnp.sum(positive_mask * log_prob, axis=1, keepdims=True)
              / jnp.maximum(pos_cnt, 1.0))                             # (B, 1)
    loss_ref[0, 0] = -jnp.sum(row_lp) * (1.0 / batch)                  # mean


# ----------------------------------------------------------------------------
# pallas_call builders (one compiled step function per batch size)
# ----------------------------------------------------------------------------
_VSPEC = pl.BlockSpec(memory_space=pltpu.MemorySpace.VMEM)
_SSPEC = pl.BlockSpec(memory_space=pltpu.MemorySpace.SMEM)


def _make_warmup_fn(batch, mem, h_channel):
    kern = functools.partial(_proj_update_kernel, batch=batch)
    call = pl.pallas_call(
        kern,
        out_shape=jax.ShapeDtypeStruct((mem, h_channel), jnp.float32),
        in_specs=[_VSPEC, _VSPEC, _VSPEC, _VSPEC],
        out_specs=_VSPEC,
    )

    def step(x, w_t, b, bank_f, bank_l, labels):
        x = x.astype(jnp.float32)
        cur_lab = jnp.reshape(labels, (-1, 1)).astype(jnp.int32)
        new_bank_l = jnp.concatenate([bank_l[batch:], cur_lab], axis=0)
        new_bank_f = call(x, w_t, b, bank_f)
        return new_bank_f, new_bank_l

    return jax.jit(step)


def _make_loss_fn(batch, mem, h_channel, inv_temperature, omega):
    kern = functools.partial(_fused_loss_kernel, batch=batch,
                             inv_temperature=inv_temperature, omega=omega)
    call = pl.pallas_call(
        kern,
        out_shape=(jax.ShapeDtypeStruct((mem, h_channel), jnp.float32),
                   jax.ShapeDtypeStruct((1, 1), jnp.float32)),
        in_specs=[_VSPEC] * 6,
        out_specs=(_VSPEC, _SSPEC),
    )

    def step(x, w_t, b, bank_f, bank_l, labels):
        x = x.astype(jnp.float32)
        cur_lab = jnp.reshape(labels, (-1, 1)).astype(jnp.int32)
        new_bank_l = jnp.concatenate([bank_l[batch:], cur_lab], axis=0)
        lab_row = jnp.reshape(new_bank_l, (1, mem))
        new_bank_f, loss = call(x, w_t, b, bank_f, lab_row, cur_lab)
        return new_bank_f, new_bank_l, loss[0, 0]

    return jax.jit(step)


# ----------------------------------------------------------------------------
# Python wrapper mirroring the PyTorch module.  The feature/label memory bank
# is a device-resident FIFO (valid entries occupy the LAST `count` rows,
# newest last); `count` mirrors the list-length control flow of the reference.
# ----------------------------------------------------------------------------
class IntraAffinitiveContrastiveLossPallas:
    def __init__(self, n_class, memory, n_channel=625, h_channel=256,
                 temperature=0.1, epsilon=0.1, key=None):
        self.n_class = n_class
        self.n_channel = n_channel
        self.h_channel = h_channel
        self.inv_temperature = float(1.0 / temperature)
        self.omega = float(math.exp(-epsilon))
        self.mem = int(memory)

        # cl_fc parameters (stored transposed: y = x @ W_t + b).
        # TODO(synk): not bit-identical to torch.nn.Linear's default init.
        if key is None:
            key = jax.random.PRNGKey(0)
        kw, kb = jax.random.split(key)
        bound = 1.0 / math.sqrt(n_channel)
        self.w_t = jax.random.uniform(kw, (n_channel, h_channel),
                                      jnp.float32, -bound, bound)
        self.b = jax.random.uniform(kb, (1, h_channel),
                                    jnp.float32, -bound, bound)

        # Device-resident FIFO memory bank (replaces the Python lists).
        self.bank_f = jnp.zeros((self.mem, h_channel), jnp.float32)
        self.bank_l = jnp.full((self.mem, 1), -1, jnp.int32)
        self.count = 0

        # TODO(synk): forward pass only; the autograd path through cl_fc and
        # the current-batch anchors (bank entries are detached) is not wired.
        self._step_fns = {}

    def _fns(self, batch):
        if batch not in self._step_fns:
            self._step_fns[batch] = (
                _make_warmup_fn(batch, self.mem, self.h_channel),
                _make_loss_fn(batch, self.mem, self.h_channel,
                              self.inv_temperature, self.omega))
        return self._step_fns[batch]

    def __call__(self, features, labels):
        batch = features.shape[0]
        warm_fn, loss_fn = self._fns(batch)

        # Mirror the reference's list-length bookkeeping (append, pop-if-over).
        self.count += batch
        if self.count > self.mem:
            self.count -= batch

        if self.count == self.mem:
            self.bank_f, self.bank_l, loss = loss_fn(
                features, self.w_t, self.b, self.bank_f, self.bank_l, labels)
        else:
            self.bank_f, self.bank_l = warm_fn(
                features, self.w_t, self.b, self.bank_f, self.bank_l, labels)
            loss = jnp.zeros((), jnp.float32)
        return loss


if __name__ == "__main__":
    # Small shapes consistent with the module's forward:
    #   features: (batch, n_channel), labels: (batch,)
    # h_channel chosen lane-dense (multiple of 128).
    n_class = 4
    memory = 16
    batch = 8
    n_channel = 32
    h_channel = 128

    module = IntraAffinitiveContrastiveLossPallas(
        n_class=n_class, memory=memory,
        n_channel=n_channel, h_channel=h_channel,
        temperature=0.1, epsilon=0.1,
        key=jax.random.PRNGKey(0))

    key = jax.random.PRNGKey(0)
    k1, k2, k3, k4 = jax.random.split(key, 4)

    # First call: bank has < memory entries -> loss = 0 (warm-up kernel only).
    x1 = jax.random.normal(k1, (batch, n_channel), jnp.float32)
    y1 = jax.random.randint(k2, (batch,), 0, n_class, jnp.int32)
    loss1 = module(x1, y1)
    jax.block_until_ready(module.bank_f)   # warm-up kernel actually ran

    # Second call: bank reaches `memory` entries -> fused loss kernel runs.
    x2 = jax.random.normal(k3, (batch, n_channel), jnp.float32)
    y2 = jax.random.randint(k4, (batch,), 0, n_class, jnp.int32)
    loss2 = module(x2, y2)

    jax.block_until_ready(loss1)
    jax.block_until_ready(loss2)
    print("KERNEL_OK")
</pallas_src>

<mosaic_0001>
module attributes {stable_mosaic.version = 11 : i64} {
  func.func @_proj_update_kernel(%arg0: memref<8x32xf32, #tpu.memory_space<vmem>>, %arg1: memref<32x128xf32, #tpu.memory_space<vmem>>, %arg2: memref<1x128xf32, #tpu.memory_space<vmem>>, %arg3: memref<16x128xf32, #tpu.memory_space<vmem>>, %arg4: memref<16x128xf32, #tpu.memory_space<vmem>>) attributes {dimension_semantics = [], scalar_prefetch = 0 : i64, scratch_operands = 0 : i64, tpu.core_type = #tpu.core_type<tc>} {
    %c0 = arith.constant 0 : index
    %c0_0 = arith.constant 0 : index
    %0 = vector.load %arg0[%c0, %c0_0] : memref<8x32xf32, #tpu.memory_space<vmem>>, vector<8x32xf32>
    %c0_1 = arith.constant 0 : index
    %c0_2 = arith.constant 0 : index
    %1 = vector.load %arg1[%c0_1, %c0_2] : memref<32x128xf32, #tpu.memory_space<vmem>>, vector<32x128xf32>
    %c0_3 = arith.constant 0 : index
    %c0_4 = arith.constant 0 : index
    %2 = vector.load %arg2[%c0_3, %c0_4] : memref<1x128xf32, #tpu.memory_space<vmem>>, vector<1x128xf32>
    %cst = arith.constant dense<0.000000e+00> : vector<8x128xf32>
    %3 = tpu.matmul %0, %1, %cst {dimension_numbers = #tpu.dot_dimension_numbers<[1], [0], [0], [1], [0, 0, 1, 1], [], []>} : vector<8x32xf32>, vector<32x128xf32>, vector<8x128xf32> -> vector<8x128xf32>
    %4 = vector.broadcast %2 : vector<1x128xf32> to vector<8x128xf32>
    %5 = arith.addf %3, %4 : vector<8x128xf32>
    %6 = arith.mulf %5, %5 : vector<8x128xf32>
    %cst_5 = arith.constant dense<0.000000e+00> : vector<8xf32>
    %7 = vector.multi_reduction <add>, %6, %cst_5 [1] : vector<8x128xf32> to vector<8xf32>
    %8 = vector.shape_cast %7 : vector<8xf32> to vector<8x1xf32>
    %9 = math.sqrt %8 : vector<8x1xf32>
    %cst_6 = arith.constant 9.99999996E-13 : f32
    %10 = vector.broadcast %cst_6 : f32 to vector<8x1xf32>
    %11 = arith.addf %9, %10 : vector<8x1xf32>
    %cst_7 = arith.constant 1.000000e+00 : f32
    %12 = vector.broadcast %cst_7 : f32 to vector<8x1xf32>
    %13 = arith.divf %12, %11 : vector<8x1xf32>
    %14 = vector.broadcast %13 : vector<8x1xf32> to vector<8x128xf32>
    %15 = arith.mulf %5, %14 : vector<8x128xf32>
    %c8 = arith.constant 8 : index
    %c0_8 = arith.constant 0 : index
    %16 = vector.load %arg3[%c8, %c0_8] : memref<16x128xf32, #tpu.memory_space<vmem>>, vector<8x128xf32>
    %c0_9 = arith.constant 0 : index
    %c0_10 = arith.constant 0 : index
    %17 = vector.load %arg4[%c0_9, %c0_10] : memref<16x128xf32, #tpu.memory_space<vmem>>, vector<8x128xf32>
    tpu.vector_store %arg4[%c0_9, %c0_10], %16 {strides = array<i32>} : memref<16x128xf32, #tpu.memory_space<vmem>>, vector<8x128xf32>,
    %c8_11 = arith.constant 8 : index
    %c0_12 = arith.constant 0 : index
    %18 = vector.load %arg4[%c8_11, %c0_12] : memref<16x128xf32, #tpu.memory_space<vmem>>, vector<8x128xf32>
    tpu.vector_store %arg4[%c8_11, %c0_12], %15 {strides = array<i32>} : memref<16x128xf32, #tpu.memory_space<vmem>>, vector<8x128xf32>,
    return
  }
}

</mosaic_0001>

<bundles_post_ra>
// kernel: step.1
= control target key start
LH: loop header
LB: loop body
LE: loop exit
PB: predicated region body
PF: predicated region fallthrough
CT: control target
= control target key end

     0   :  { %9 = vsyncpa [#allocation3], 0  ;;  %s351_s0 = inlined_call_operand.hbm [shape: f32[8,32], index: 0, kind: input, shape index: {}]   ;;  %s352_s1 = inlined_call_operand.hbm [shape: f32[32,128], index: 1, kind: input, shape index: {}]   ;;  %s353_s2 = inlined_call_operand.vmem [shape: f32[1,128], index: 2, kind: input, shape index: {}]   ;;  %s354_s3 = inlined_call_operand.hbm [shape: f32[16,128], index: 3, kind: input, shape index: {}]   ;;  %s355_s4 = inlined_call_operand.hbm [shape: f32[16,128], index: 4, kind: output, shape index: {}]  }
   0x1   :  { %10 = vsyncpa [#allocation6], 0 }
   0x2   :  { %11 = vsyncpa [#allocation4], 0  ;;  %s294_s15 = smov [#allocation5]  }
   0x3   :  { %s27_s16 = sshll.u32 %s294_s15, 4  ;;  %s28_s16 = int_to_ptr.vmem [resolvable:$true] %s27_s16 }
   0x4   :  { %s216_s17 = scalar_lea.vmem %s28_s16, 512  ;;  %p221_p1 = scmp.lt.s32.totalorder %s28_s16, %s28_s16 }
   0x5   :  { %p217_p0 = scmp.ne.s32.totalorder %s28_s16, %s216_s17  ;;  %p222_p2 = scmp.lt.s32.totalorder %s216_s17, %s216_s17 }
   0x7   :  { %p223_p3 = por %p222_p2, %p221_p1 }
   0x9   :  { %p224_p4 = pnand %p223_p3, %p217_p0 }
   0xb   :  { %227 = shalt.err (!%p224_p4)
}
   0xc   :  { %s295_s18 = smov 128   ;;  %s296_s19 = smov 8  }
   0xd   :  { %33 = dma.hbm_to_vmem [thread:$0]  %s352_s1, 512, %s28_s16, [#allocation6], %s295_s18, %s295_s18, %s296_s19  }
   0xe   :  { %s297_s22 = smov [#allocation2]   ;;  %s298_s24 = smov [#allocation7]  }
   0xf   :  { %s18_s23 = sshll.u32 %s297_s22, 4  ;;  %s41_s25 = sshll.u32 %s298_s24, 4  ;;  %s19_s23 = int_to_ptr.vmem [resolvable:$true] %s18_s23  ;;  %s42_s25 = int_to_ptr.vmem [resolvable:$true] %s41_s25 }
  0x10   :  { %s236_s26 = scalar_lea.vmem %s19_s23, 128  ;;  %p241_p6 = scmp.lt.s32.totalorder %s19_s23, %s19_s23 }
  0x11   :  { %p237_p5 = scmp.ne.s32.totalorder %s19_s23, %s236_s26  ;;  %p242_p7 = scmp.lt.s32.totalorder %s236_s26, %s236_s26 }
  0x13   :  { %p243_p8 = por %p242_p7, %p241_p6 }
  0x15   :  { %p244_p9 = pnand %p243_p8, %p237_p5 }
  0x17   :  { %247 = shalt.err (!%p244_p9)
}
  0x18   :  { %21 = dma.hbm_to_vmem [thread:$0]  %s351_s0, 128, %s19_s23, [#allocation3]  }
  0x19   :  { %s256_s29 = scalar_lea.vmem %s42_s25, 256  ;;  %p261_p11 = scmp.lt.s32.totalorder %s42_s25, %s42_s25 }
  0x1a   :  { %p257_p10 = scmp.ne.s32.totalorder %s42_s25, %s256_s29  ;;  %p262_p12 = scmp.lt.s32.totalorder %s256_s29, %s256_s29 }
  0x1c   :  { %p263_p13 = por %p262_p12, %p261_p11 }
  0x1e   :  { %p264_p0 = pnand %p263_p13, %p257_p10 }
  0x20   :  { %267 = shalt.err (!%p264_p0)
}
  0x21   :  { %47 = dma.hbm_to_vmem [thread:$0]  %s354_s3, 256, %s42_s25, [#allocation6], %s295_s18, %s295_s18, %s296_s19  }
  0x22   :  { %288 = dma.done.wait [#allocation3], 128  }
  0x23   :  { %289 = vsyncadd [#allocation3], 4294967168 }
  0x24   :  { %290 = dma.done.wait [#allocation6], 768  }
  0x25   :  { %291 = vsyncadd [#allocation6], 4294966528  ;;  %v299_v0 = vmov 0.0   ;;  %vm300_vm0 = vmmov 0   ;;  %v61_v1 = vld [vmem:[#allocation5 + $0x18] sm:$0xff]  ;;  %v60_v2 = vld [vmem:[#allocation5 + $0x10] sm:$0xff] }
  0x26   :  { %185 = vmatprep.subr.mxu0 %v299_v0  ;;  %193 = vmatprep.mubr.msk.f32.mxu0 %vm300_vm0, %v299_v0  ;;  %v59_v3 = vld [vmem:[#allocation5 + $0x8] sm:$0xff]  ;;  %v58_v4 = vld [vmem:[#allocation5] sm:$0xff]  ;;  %v57_v5 = vld [vmem:[#allocation2] sm:$0xff]  ;;  %vm69_vm1 = vcmask 261120   ;;  %s301_s5 = smov [#allocation8]  }
  0x27   :  { %186 = vmatpush3.msra.mxu0 %v61_v1  ;;  %v178_v6 = vld [vmem:[%s353_s2] ss:$0 sm:$0xff]  ;;  %v157_v11 = vld [vmem:[#allocation7 + $0x8] sm:$0xff]  ;;  %s165_s2 = sshll.u32 %s301_s5, 4  ;;  %s166_s2 = int_to_ptr.vmem [resolvable:$true] %s165_s2 }
  0x28   :  { %187 = vmatprep.subr.mxu0 %v299_v0  ;;  %158 = vst [vmem:[#allocation8] sm:$0xff] %v157_v11  ;;  %s268_s6 = scalar_lea.vmem %s166_s2, 256  ;;  %p273_p2 = scmp.lt.s32.totalorder %s166_s2, %s166_s2 }
  0x29   :  { %188 = vmatpush3.msra.mxu0 %v60_v2  ;;  %p269_p1 = scmp.ne.s32.totalorder %s166_s2, %s268_s6  ;;  %p274_p3 = scmp.lt.s32.totalorder %s268_s6, %s268_s6 }
  0x2a   :  { %189 = vmatprep.subr.mxu0 %v299_v0 }
  0x2b   :  { %190 = vmatpush3.msra.mxu0 %v59_v3  ;;  %p275_p4 = por %p274_p3, %p273_p2 }
  0x2c   :  { %191 = vmatprep.subr.mxu0 %v299_v0 }
  0x2d   :  { %192 = vmatpush3.msra.mxu0 %v58_v4  ;;  %p276_p5 = pnand %p275_p4, %p269_p1 }
  0x2e   :  { %194 = vmatmul.mubr.msk.f32.vlgmr.msra.gmra.mxu0 %vm69_vm1, %v57_v5 }
  0xee   :  { %v139_v7 = vpop.f32.mrf.mxu0 }
  0xef   :  { %v140_v8 = vadd.f32 %v178_v6, %v139_v7 }
  0xf0   :  { %v195_v9 = vpop.f32.mrf.mxu0 }
  0xf1   :  { %v143_v10 = vmul.f32 %v140_v8, %v140_v8 }
  0xf3   :  { %144 = vadd.xlane.f32.xlu0 %v143_v10 }
 0x17c   :  { %v145_v12 = vpop.xlane.xlu0 %144 }
 0x17d   :  { %204 = vrsqrt.f32 %v145_v12  ;;  %vm148_vm2 = vcmp.eq.f32.partialorder %v145_v12, inf  ;;  %v151_v15 = vand.u32 2147483648, %v145_v12  ;;  %vm150_vm3 = vcmp.eq.f32.partialorder %v145_v12, 0.0 }
 0x18a   :  { %v205_v13 = vpop.eup %204 }
 0x18b   :  { %v147_v14 = vmul.f32 %v205_v13, %v145_v12 }
 0x18d   :  { %v149_v16 = vsel %vm148_vm2, %v145_v12, %v147_v14 }
 0x18e   :  { %v152_v17 = vsel %vm150_vm3, %v151_v15, %v149_v16 }
 0x18f   :  { %v153_v18 = vadd.f32 1e-12, %v152_v17 }
 0x191   :  { %206 = vrcp.f32 %v153_v18 }
 0x19e   :  { %v207_v19 = vpop.eup %206 }
 0x19f   :  { %v156_v20 = vmul.f32 %v207_v19, %v140_v8 }
 0x1a1   :  { %159 = vst [vmem:[#allocation8 + $0x8] sm:$0xff] %v156_v20 }
 0x1a2   :  { %279 = shalt.err (!%p276_p5)
}
 0x1a3   :  { %171 = dma.vmem_to_hbm [thread:$0]  %s166_s2, 256, %s355_s4, [#allocation4], %s295_s18, %s295_s18, %s296_s19  }
 0x1a4   :  { %292 = dma.done.wait [#allocation4], 256  }
 0x1a5   :  { %293 = vsyncadd [#allocation4], 4294967040 }
 0x1a6   :  { %175 = vsyncpa [#allocation3], 1 }
 0x1a7   :  { %176 = vsyncpa [#allocation6], 1 }
 0x1a8   :  { %177 = vsyncpa [#allocation4], 1 }

</bundles_post_ra>
